<compile_context>
chip_gen: v7x
topology: tpu7x:2x2x1
jax: 0.10.0
libtpu: 0.0.40
codegen_flags: <defaults>
</compile_context>

<pallas_src>
import functools

import jax
import jax.numpy as jnp
from jax.experimental import pallas as pl
from jax.experimental.pallas import tpu as pltpu

N_STATES = 10
N_ACTIONS = 20
MAX_INSULIN = 20.0
MAX_BATCH_TILE = 2048          # rows per grid step (multiple of 8)
ACT_VMEM_BUDGET = 8 << 20      # bytes allowed for double-buffered activation blocks


def _qlearning_kernel(*refs, n_states, cgm_col, has_other):
    if has_other:
        (xc_ref, xo_ref, w1c_ref, w1o_ref, b1_ref, w2_ref, b2_ref,
         w3_ref, blend_ref, out_ref) = refs
    else:
        (xc_ref, w1c_ref, b1_ref, w2_ref, b2_ref,
         w3_ref, blend_ref, out_ref) = refs

    # ---- neural-network branch (MXU matmuls + VPU relu) ----
    xc = xc_ref[...]                                                    # (TB, T*F)
    h1 = jnp.dot(xc, w1c_ref[...], preferred_element_type=jnp.float32)
    if has_other:
        h1 = h1 + jnp.dot(xo_ref[...], w1o_ref[...],
                          preferred_element_type=jnp.float32)
    h1 = jnp.maximum(h1 + b1_ref[...], 0.0)                             # ReLU
    # Dropout(0.2): identity in eval mode.
    h2 = jnp.dot(h1, w2_ref[...], preferred_element_type=jnp.float32) + b2_ref[...]
    h2 = jnp.maximum(h2, 0.0)                                           # ReLU
    # head with sigmoid(alpha) pre-folded into w3: (TB,32)·(32,) -> VPU mul + lane reduce
    nn_pred = jnp.sum(h2 * w3_ref[...], axis=-1, keepdims=True)         # (TB, 1)

    # ---- Q-learning branch: discretize cgm[i,0,-1] -> state -> greedy insulin ----
    # TODO(synk): epsilon-greedy exploration uses host RNG in PyTorch; here we take
    # the deterministic greedy (argmax) branch (argmax precomputed in the wrapper).
    v = xc[:, cgm_col:cgm_col + 1]                                      # (TB, 1) = cgm[i,0,-1]
    is_norm = jnp.logical_and(v >= -3.0, v <= 3.0)
    # Both paths are affine-then-clip: norm = clip(v*scale + shift, 0, 1)
    #   normalized CGM: ((v+1)/2)            -> scale=0.5,    shift=0.5
    #   raw mg/dL:      ((clip(v,40,400)-40)/360) -> scale=1/360, shift=-40/360
    scale = jnp.where(is_norm, 0.5, 1.0 / 360.0)
    shift = jnp.where(is_norm, 0.5, -40.0 / 360.0)
    norm = jnp.clip(v * scale + shift, 0.0, 1.0)
    state = (norm * (n_states - 1)).astype(jnp.int32)                   # trunc, like int()

    tb = xc.shape[0]
    lane = jax.lax.broadcasted_iota(jnp.int32, (tb, n_states), 1)
    # blend_ref[s] = sigmoid(alpha)*b3 + (1-sigmoid(alpha))*insulin(argmax_a Q[s,a])
    ql_pred = jnp.sum(jnp.where(lane == state, blend_ref[...], 0.0),
                      axis=-1, keepdims=True)                           # (TB, 1)

    out_ref[...] = nn_pred + ql_pred


def qlearning_forward(cgm_data, other_features, params):
    """Eval-mode forward of QlearningModel.

    cgm_data: (B, T, F), other_features: (B, ...). params weights are stored in
    (in, out) layout (PyTorch weight.T) so no per-call transposes are needed.
    """
    B, T, F = cgm_data.shape
    TF = T * F
    cgm_flat = jnp.asarray(cgm_data, jnp.float32).reshape(B, TF)
    other_flat = jnp.asarray(other_features, jnp.float32).reshape(B, -1)
    O = other_flat.shape[1]
    has_other = O > 0

    w1 = jnp.asarray(params["w1"], jnp.float32)          # (TF+O, H1)
    H1 = w1.shape[1]
    w2 = jnp.asarray(params["w2"], jnp.float32)          # (H1, H2)
    H2 = w2.shape[1]
    b1 = jnp.asarray(params["b1"], jnp.float32).reshape(1, H1)
    b2 = jnp.asarray(params["b2"], jnp.float32).reshape(1, H2)

    # Fold sigmoid(alpha) into the head weights ...
    alpha = jax.nn.sigmoid(jnp.asarray(params["alpha"], jnp.float32).reshape(()))
    w3_row = jnp.asarray(params["w3"], jnp.float32).reshape(1, H2) * alpha
    # ... and alpha*b3 + (1-alpha)*insulin(greedy action) into a per-state table.
    greedy = jnp.argmax(jnp.asarray(params["q_table"], jnp.float32), axis=1)
    insulin = greedy.astype(jnp.float32) / (N_ACTIONS - 1) * MAX_INSULIN
    b3 = jnp.asarray(params["b3"], jnp.float32).reshape(())
    blend = (alpha * b3 + (1.0 - alpha) * insulin).reshape(1, N_STATES)

    # Split w1 so the kernel can consume cgm/other without a wrapper concat.
    w1c = w1[:TF]
    w1o = w1[TF:] if has_other else None

    # Batch tile: full batch if small (block == full dim is always legal);
    # otherwise multiples of 8, kept within a VMEM budget for double-buffering.
    D = TF + O
    TB = min(B, MAX_BATCH_TILE)
    while TB > 8 and 2 * TB * D * 4 > ACT_VMEM_BUDGET:
        TB //= 2
    if TB < B:
        TB = max(8, (TB // 8) * 8)
    grid = (pl.cdiv(B, TB),)

    def tiled(cols):   # activation blocks, tiled over the batch axis
        return pl.BlockSpec((TB, cols), lambda i: (i, 0))

    def const(shape):  # weight/bias blocks stay VMEM-resident across grid steps
        return pl.BlockSpec(shape, lambda i: (0, 0))

    operands = [cgm_flat]
    in_specs = [tiled(TF)]
    if has_other:
        operands.append(other_flat)
        in_specs.append(tiled(O))
    operands.append(w1c)
    in_specs.append(const((TF, H1)))
    if has_other:
        operands.append(w1o)
        in_specs.append(const((O, H1)))
    operands += [b1, w2, b2, w3_row, blend]
    in_specs += [const((1, H1)), const((H1, H2)), const((1, H2)),
                 const((1, H2)), const((1, N_STATES))]

    kern = functools.partial(_qlearning_kernel, n_states=N_STATES,
                             cgm_col=F - 1, has_other=has_other)

    # TODO(synk): training-mode _schedule_update / async Q-table updates are a
    # host-side numpy queue in PyTorch; eval forward only.
    return pl.pallas_call(
        kern,
        out_shape=jax.ShapeDtypeStruct((B, 1), jnp.float32),
        grid=grid,
        in_specs=in_specs,
        out_specs=pl.BlockSpec((TB, 1), lambda i: (i, 0)),
        compiler_params=pltpu.CompilerParams(
            dimension_semantics=("parallel",)),
    )(*operands)


def _reference_forward(cgm, other, params):
    """Pure-JAX reference matching the PyTorch eval forward (greedy Q branch)."""
    B = cgm.shape[0]
    combined = jnp.concatenate([cgm.reshape(B, -1), other.reshape(B, -1)], axis=1)
    h1 = jnp.maximum(combined @ params["w1"] + params["b1"], 0.0)
    h2 = jnp.maximum(h1 @ params["w2"] + params["b2"], 0.0)
    nn_pred = h2 @ params["w3"] + params["b3"]
    alpha = jax.nn.sigmoid(params["alpha"].reshape(()))
    v = cgm[:, 0, -1]
    is_norm = (v >= -3.0) & (v <= 3.0)
    norm = jnp.where(is_norm,
                     jnp.clip((v + 1.0) / 2.0, 0.0, 1.0),
                     (jnp.clip(v, 40.0, 400.0) - 40.0) / 360.0)
    state = (norm * (N_STATES - 1)).astype(jnp.int32)
    greedy = jnp.argmax(params["q_table"], axis=1)
    insulin = greedy.astype(jnp.float32) / (N_ACTIONS - 1) * MAX_INSULIN
    ql_pred = insulin[state].reshape(B, 1)
    return alpha * nn_pred + (1.0 - alpha) * ql_pred


if __name__ == "__main__":
    key = jax.random.PRNGKey(0)
    B, T, F, O = 2, 16, 4, 8          # cgm_shape=(16,4), other_features_shape=(8,)
    D = T * F + O

    ks = jax.random.split(key, 9)
    params = {
        # stored in (in, out) layout, i.e. PyTorch weight.T, so no per-call transpose
        "w1": jax.random.normal(ks[0], (D, 64), jnp.float32) * 0.1,
        "b1": jax.random.normal(ks[1], (64,), jnp.float32) * 0.01,
        "w2": jax.random.normal(ks[2], (64, 32), jnp.float32) * 0.1,
        "b2": jax.random.normal(ks[3], (32,), jnp.float32) * 0.01,
        "w3": jax.random.normal(ks[4], (32, 1), jnp.float32) * 0.1,
        "b3": jax.random.normal(ks[5], (1,), jnp.float32) * 0.01,
        # deterministic synthetic Q-table (module would init to zeros/optimistic const)
        "q_table": jax.random.uniform(ks[6], (N_STATES, N_ACTIONS), jnp.float32),
        "alpha": jnp.array([0.5], jnp.float32),
    }

    cgm = jax.random.normal(ks[7], (B, T, F), jnp.float32)
    other = jax.random.normal(ks[8], (B, O), jnp.float32)

    out = qlearning_forward(cgm, other, params)
    jax.block_until_ready(out)
    assert out.shape == (B, 1) and out.dtype == jnp.float32

    ref = _reference_forward(cgm, other, params)
    assert jnp.allclose(out, ref, atol=1e-3, rtol=1e-3), (out, ref)
    print("KERNEL_OK")
</pallas_src>

<mosaic_0001>
module attributes {stable_mosaic.version = 11 : i64} {
  func.func @_qlearning_kernel(%arg0: i32, %arg1: memref<2x64xf32, #tpu.memory_space<vmem>>, %arg2: memref<2x8xf32, #tpu.memory_space<vmem>>, %arg3: memref<64x64xf32, #tpu.memory_space<vmem>>, %arg4: memref<8x64xf32, #tpu.memory_space<vmem>>, %arg5: memref<1x64xf32, #tpu.memory_space<vmem>>, %arg6: memref<64x32xf32, #tpu.memory_space<vmem>>, %arg7: memref<1x32xf32, #tpu.memory_space<vmem>>, %arg8: memref<1x32xf32, #tpu.memory_space<vmem>>, %arg9: memref<1x10xf32, #tpu.memory_space<vmem>>, %arg10: memref<2x1xf32, #tpu.memory_space<vmem>>) attributes {dimension_semantics = [#tpu.dimension_semantics<parallel>], iteration_bounds = array<i64: 1>, scalar_prefetch = 0 : i64, scratch_operands = 0 : i64, tpu.core_type = #tpu.core_type<tc>, window_params = [{transform_indices = @transform_0, window_bounds = array<i64: 2, 64>}, {transform_indices = @transform_1, window_bounds = array<i64: 2, 8>}, {pipeline_mode = #tpu.pipeline_mode<synchronous>, transform_indices = @transform_2, window_bounds = array<i64: 64, 64>}, {pipeline_mode = #tpu.pipeline_mode<synchronous>, transform_indices = @transform_3, window_bounds = array<i64: 8, 64>}, {pipeline_mode = #tpu.pipeline_mode<synchronous>, transform_indices = @transform_4, window_bounds = array<i64: 1, 64>}, {pipeline_mode = #tpu.pipeline_mode<synchronous>, transform_indices = @transform_5, window_bounds = array<i64: 64, 32>}, {pipeline_mode = #tpu.pipeline_mode<synchronous>, transform_indices = @transform_6, window_bounds = array<i64: 1, 32>}, {pipeline_mode = #tpu.pipeline_mode<synchronous>, transform_indices = @transform_7, window_bounds = array<i64: 1, 32>}, {pipeline_mode = #tpu.pipeline_mode<synchronous>, transform_indices = @transform_8, window_bounds = array<i64: 1, 10>}, {transform_indices = @transform_9, window_bounds = array<i64: 2, 1>}]} {
    %c0 = arith.constant 0 : index
    %c0_0 = arith.constant 0 : index
    %0 = vector.load %arg1[%c0, %c0_0] : memref<2x64xf32, #tpu.memory_space<vmem>>, vector<2x64xf32>
    %c0_1 = arith.constant 0 : index
    %c0_2 = arith.constant 0 : index
    %1 = vector.load %arg3[%c0_1, %c0_2] : memref<64x64xf32, #tpu.memory_space<vmem>>, vector<64x64xf32>
    %cst = arith.constant dense<0.000000e+00> : vector<2x64xf32>
    %2 = tpu.matmul %0, %1, %cst {dimension_numbers = #tpu.dot_dimension_numbers<[1], [0], [0], [1], [0, 0, 1, 1], [], []>} : vector<2x64xf32>, vector<64x64xf32>, vector<2x64xf32> -> vector<2x64xf32>
    %c0_3 = arith.constant 0 : index
    %c0_4 = arith.constant 0 : index
    %3 = vector.load %arg2[%c0_3, %c0_4] : memref<2x8xf32, #tpu.memory_space<vmem>>, vector<2x8xf32>
    %c0_5 = arith.constant 0 : index
    %c0_6 = arith.constant 0 : index
    %4 = vector.load %arg4[%c0_5, %c0_6] : memref<8x64xf32, #tpu.memory_space<vmem>>, vector<8x64xf32>
    %cst_7 = arith.constant dense<0.000000e+00> : vector<2x64xf32>
    %5 = tpu.matmul %3, %4, %cst_7 {dimension_numbers = #tpu.dot_dimension_numbers<[1], [0], [0], [1], [0, 0, 1, 1], [], []>} : vector<2x8xf32>, vector<8x64xf32>, vector<2x64xf32> -> vector<2x64xf32>
    %6 = arith.addf %2, %5 : vector<2x64xf32>
    %c0_8 = arith.constant 0 : index
    %c0_9 = arith.constant 0 : index
    %7 = vector.load %arg5[%c0_8, %c0_9] : memref<1x64xf32, #tpu.memory_space<vmem>>, vector<1x64xf32>
    %8 = vector.broadcast %7 : vector<1x64xf32> to vector<2x64xf32>
    %9 = arith.addf %6, %8 : vector<2x64xf32>
    %cst_10 = arith.constant 0.000000e+00 : f32
    %10 = vector.broadcast %cst_10 : f32 to vector<2x64xf32>
    %11 = arith.maximumf %9, %10 : vector<2x64xf32>
    %c0_11 = arith.constant 0 : index
    %c0_12 = arith.constant 0 : index
    %12 = vector.load %arg6[%c0_11, %c0_12] : memref<64x32xf32, #tpu.memory_space<vmem>>, vector<64x32xf32>
    %cst_13 = arith.constant dense<0.000000e+00> : vector<2x32xf32>
    %13 = tpu.matmul %11, %12, %cst_13 {dimension_numbers = #tpu.dot_dimension_numbers<[1], [0], [0], [1], [0, 0, 1, 1], [], []>} : vector<2x64xf32>, vector<64x32xf32>, vector<2x32xf32> -> vector<2x32xf32>
    %c0_14 = arith.constant 0 : index
    %c0_15 = arith.constant 0 : index
    %14 = vector.load %arg7[%c0_14, %c0_15] : memref<1x32xf32, #tpu.memory_space<vmem>>, vector<1x32xf32>
    %15 = vector.broadcast %14 : vector<1x32xf32> to vector<2x32xf32>
    %16 = arith.addf %13, %15 : vector<2x32xf32>
    %cst_16 = arith.constant 0.000000e+00 : f32
    %17 = vector.broadcast %cst_16 : f32 to vector<2x32xf32>
    %18 = arith.maximumf %16, %17 : vector<2x32xf32>
    %c0_17 = arith.constant 0 : index
    %c0_18 = arith.constant 0 : index
    %19 = vector.load %arg8[%c0_17, %c0_18] : memref<1x32xf32, #tpu.memory_space<vmem>>, vector<1x32xf32>
    %20 = vector.broadcast %19 : vector<1x32xf32> to vector<2x32xf32>
    %21 = arith.mulf %18, %20 : vector<2x32xf32>
    %cst_19 = arith.constant dense<0.000000e+00> : vector<2xf32>
    %22 = vector.multi_reduction <add>, %21, %cst_19 [1] : vector<2x32xf32> to vector<2xf32>
    %23 = vector.shape_cast %22 : vector<2xf32> to vector<2x1xf32>
    %24 = vector.extract_strided_slice %0 {offsets = [0, 3], sizes = [2, 1], strides = [1, 1]} : vector<2x64xf32> to vector<2x1xf32>
    %cst_20 = arith.constant -3.000000e+00 : f32
    %25 = vector.broadcast %cst_20 : f32 to vector<2x1xf32>
    %26 = arith.cmpf oge, %24, %25 : vector<2x1xf32>
    %cst_21 = arith.constant 3.000000e+00 : f32
    %27 = vector.broadcast %cst_21 : f32 to vector<2x1xf32>
    %28 = arith.cmpf ole, %24, %27 : vector<2x1xf32>
    %29 = arith.andi %26, %28 : vector<2x1xi1>
    %cst_22 = arith.constant 5.000000e-01 : f32
    %cst_23 = arith.constant 0.00277777785 : f32
    %30 = vector.broadcast %cst_22 : f32 to vector<2x1xf32>
    %31 = vector.broadcast %cst_23 : f32 to vector<2x1xf32>
    %32 = arith.select %29, %30, %31 : vector<2x1xi1>, vector<2x1xf32>
    %cst_24 = arith.constant 5.000000e-01 : f32
    %cst_25 = arith.constant -0.111111112 : f32
    %33 = vector.broadcast %cst_24 : f32 to vector<2x1xf32>
    %34 = vector.broadcast %cst_25 : f32 to vector<2x1xf32>
    %35 = arith.select %29, %33, %34 : vector<2x1xi1>, vector<2x1xf32>
    %36 = arith.mulf %24, %32 : vector<2x1xf32>
    %37 = arith.addf %36, %35 : vector<2x1xf32>
    %cst_26 = arith.constant 0.000000e+00 : f32
    %cst_27 = arith.constant 1.000000e+00 : f32
    %38 = vector.broadcast %cst_26 : f32 to vector<2x1xf32>
    %39 = arith.maximumf %38, %37 : vector<2x1xf32>
    %40 = vector.broadcast %cst_27 : f32 to vector<2x1xf32>
    %41 = arith.minimumf %40, %39 : vector<2x1xf32>
    %cst_28 = arith.constant 9.000000e+00 : f32
    %42 = vector.broadcast %cst_28 : f32 to vector<2x1xf32>
    %43 = arith.mulf %41, %42 : vector<2x1xf32>
    %44 = arith.fptosi %43 : vector<2x1xf32> to vector<2x1xi32>
    %45 = tpu.iota {dimensions = array<i32: 1>} : vector<2x10xi32>
    %46 = vector.broadcast %44 : vector<2x1xi32> to vector<2x10xi32>
    %47 = arith.cmpi eq, %45, %46 : vector<2x10xi32>
    %c0_29 = arith.constant 0 : index
    %c0_30 = arith.constant 0 : index
    %48 = vector.load %arg9[%c0_29, %c0_30] : memref<1x10xf32, #tpu.memory_space<vmem>>, vector<1x10xf32>
    %cst_31 = arith.constant 0.000000e+00 : f32
    %49 = vector.shape_cast %48 : vector<1x10xf32> to vector<1x10xf32>
    %50 = vector.broadcast %49 : vector<1x10xf32> to vector<2x10xf32>
    %51 = vector.broadcast %cst_31 : f32 to vector<2x10xf32>
    %52 = arith.select %47, %50, %51 : vector<2x10xi1>, vector<2x10xf32>
    %cst_32 = arith.constant dense<0.000000e+00> : vector<2xf32>
    %53 = vector.multi_reduction <add>, %52, %cst_32 [1] : vector<2x10xf32> to vector<2xf32>
    %54 = vector.shape_cast %53 : vector<2xf32> to vector<2x1xf32>
    %55 = arith.addf %23, %54 : vector<2x1xf32>
    %c0_33 = arith.constant 0 : index
    %c0_34 = arith.constant 0 : index
    %56 = vector.load %arg10[%c0_33, %c0_34] : memref<2x1xf32, #tpu.memory_space<vmem>>, vector<2x1xf32>
    tpu.vector_store %arg10[%c0_33, %c0_34], %55 {strides = array<i32>} : memref<2x1xf32, #tpu.memory_space<vmem>>, vector<2x1xf32>,
    return
  }
  func.func @transform_0(%arg0: i32) -> (i32, i32) {
    %c0_i32 = arith.constant 0 : i32
    %c0_i32_0 = arith.constant 0 : i32
    return %arg0, %c0_i32 : i32, i32
  }
  func.func @transform_1(%arg0: i32) -> (i32, i32) {
    %c0_i32 = arith.constant 0 : i32
    %c0_i32_0 = arith.constant 0 : i32
    return %arg0, %c0_i32 : i32, i32
  }
  func.func @transform_2(%arg0: i32) -> (i32, i32) {
    %c0_i32 = arith.constant 0 : i32
    %c0_i32_0 = arith.constant 0 : i32
    %c0_i32_1 = arith.constant 0 : i32
    return %c0_i32, %c0_i32_0 : i32, i32
  }
  func.func @transform_3(%arg0: i32) -> (i32, i32) {
    %c0_i32 = arith.constant 0 : i32
    %c0_i32_0 = arith.constant 0 : i32
    %c0_i32_1 = arith.constant 0 : i32
    return %c0_i32, %c0_i32_0 : i32, i32
  }
  func.func @transform_4(%arg0: i32) -> (i32, i32) {
    %c0_i32 = arith.constant 0 : i32
    %c0_i32_0 = arith.constant 0 : i32
    %c0_i32_1 = arith.constant 0 : i32
    return %c0_i32, %c0_i32_0 : i32, i32
  }
  func.func @transform_5(%arg0: i32) -> (i32, i32) {
    %c0_i32 = arith.constant 0 : i32
    %c0_i32_0 = arith.constant 0 : i32
    %c0_i32_1 = arith.constant 0 : i32
    return %c0_i32, %c0_i32_0 : i32, i32
  }
  func.func @transform_6(%arg0: i32) -> (i32, i32) {
    %c0_i32 = arith.constant 0 : i32
    %c0_i32_0 = arith.constant 0 : i32
    %c0_i32_1 = arith.constant 0 : i32
    return %c0_i32, %c0_i32_0 : i32, i32
  }
  func.func @transform_7(%arg0: i32) -> (i32, i32) {
    %c0_i32 = arith.constant 0 : i32
    %c0_i32_0 = arith.constant 0 : i32
    %c0_i32_1 = arith.constant 0 : i32
    return %c0_i32, %c0_i32_0 : i32, i32
  }
  func.func @transform_8(%arg0: i32) -> (i32, i32) {
    %c0_i32 = arith.constant 0 : i32
    %c0_i32_0 = arith.constant 0 : i32
    %c0_i32_1 = arith.constant 0 : i32
    return %c0_i32, %c0_i32_0 : i32, i32
  }
  func.func @transform_9(%arg0: i32) -> (i32, i32) {
    %c0_i32 = arith.constant 0 : i32
    %c0_i32_0 = arith.constant 0 : i32
    return %arg0, %c0_i32 : i32, i32
  }
}

</mosaic_0001>

<bundles_post_ra>
// kernel: tpu_custom_call.1
= control target key start
LH: loop header
LB: loop body
LE: loop exit
PB: predicated region body
PF: predicated region fallthrough
CT: control target
= control target key end

     0   :  { %v440_v0 = vmov 0.0|0.0   ;;  %v441_v4 = vmov 0.0   ;;  %vm442_vm0 = vmmov 0   ;;  %vm43_vm1 = vcmask 64512   ;;  %s573_s2 = inlined_call_operand.vmem [shape: f32[64,64], index: 2, kind: input, shape index: {}]   ;;  %s574_s3 = inlined_call_operand.vmem [shape: f32[8,64], index: 3, kind: input, shape index: {}]   ;;  %s575_s1 = inlined_call_operand.vmem [shape: f32[2,8], index: 1, kind: input, shape index: {}]   ;;  %s576_s5 = inlined_call_operand.vmem [shape: f32[64,32], index: 5, kind: input, shape index: {}]   ;;  %s577_s0 = inlined_call_operand.vmem [shape: f32[2,64], index: 0, kind: input, shape index: {}]   ;;  %s578_s4 = inlined_call_operand.vmem [shape: f32[1,64], index: 4, kind: input, shape index: {}]   ;;  %s579_s8 = inlined_call_operand.vmem [shape: f32[1,10], index: 8, kind: input, shape index: {}]   ;;  %s580_s6 = inlined_call_operand.vmem [shape: f32[1,32], index: 6, kind: input, shape index: {}]   ;;  %s581_s7 = inlined_call_operand.vmem [shape: f32[1,32], index: 7, kind: input, shape index: {}]   ;;  %s582_s9 = inlined_call_operand.vmem [shape: f32[2,1], index: 9, kind: output, shape index: {}]  }
   0x1   :  { %407 = vmatprep.subr.bf16.mxu1 %v440_v0  ;;  %v33_v1 = vld [vmem:[%s573_s2] sm:$0xff]  ;;  %v34_v2 = vld [vmem:[%s573_s2 + $0x8] sm:$0xff]  ;;  %v35_v3 = vld [vmem:[%s573_s2 + $0x10] sm:$0xff]  ;;  %364 = vmatprep.subr.mxu0 %v441_v4  ;;  %vm117_vm2 = vcmask 523264   ;;  %v443_v29 = vmov 3   ;;  %v312_v49 = vlaneseq  ;;  %vm326_vm6 = vcmask 74752  }
   0x2   :  { %v408_v5 = vpack.c.bf16 %v34_v2, %v33_v1  ;;  %v36_v6 = vld [vmem:[%s573_s2 + $0x18] sm:$0xff]  ;;  %366 = vmatprep.mubr.msk.f32.mxu0 %vm442_vm0, %v441_v4  ;;  %385 = vmatprep.mubr.msk.f32.mxu1 %vm442_vm0, %v441_v4  ;;  %v37_v7 = vld [vmem:[%s573_s2 + $0x20] sm:$0xff]  ;;  %v38_v10 = vld [vmem:[%s573_s2 + $0x28] sm:$0xff]  ;;  %v444_v30 = vmov 0.0027777778   ;;  %vm297_vm8 = vcmask 254976  }
   0x3   :  { %v42_v8 = vld [vmem:[%s574_s3] sm:$0xff]  ;;  %v411_v9 = vpack.c.bf16 %v36_v6, %v35_v3  ;;  %v201_v13 = vld [vmem:[%s576_s5 + $0x8] sm:$0xff]  ;;  %v202_v14 = vld [vmem:[%s576_s5 + $0x10] sm:$0xff]  ;;  %v414_v17 = vpack.c.bf16 %v38_v10, %v37_v7  ;;  %439 = vset.pattern.permute.xlu0 %v443_v29  ;;  %v445_v32 = vmov -0.11111111   ;;  %v313_v50 = vand.u32 127, %v312_v49 }
   0x4   :  { %409 = vmatpush3.bf16.msra.mxu1 %v408_v5  ;;  %365 = vmatpush3.msra.mxu0 %v42_v8  ;;  %v41_v11 = vld [vmem:[%s575_s1] sm:$0x3]  ;;  %v203_v15 = vld [vmem:[%s576_s5 + $0x18] sm:$0xff]  ;;  %v39_v19 = vld [vmem:[%s573_s2 + $0x30] sm:$0xff]  ;;  %vm331_vm9 = vcmask 1024  }
   0x5   :  { %v200_v12 = vld [vmem:[%s576_s5] sm:$0xff]  ;;  %410 = vmatprep.subr.bf16.mxu1 %v440_v0  ;;  %367 = vmatmul.mubr.msk.f32.vlgmr.msra.gmra.mrb[0].mxu0 %vm43_vm1, %v41_v11  ;;  %v423_v18 = vpack.c.bf16 %v203_v15, %v202_v14  ;;  %v40_v20 = vld [vmem:[%s573_s2 + $0x38] sm:$0xff]  ;;  %v205_v24 = vld [vmem:[%s576_s5 + $0x28] sm:$0xff] }
   0x6   :  { %419 = vmatprep.subr.bf16.mxu0 %v440_v0  ;;  %v420_v16 = vpack.c.bf16 %v201_v13, %v200_v12  ;;  %404 = vmatprep.mubr.msk.f32.mxu0 %vm442_vm0, %v441_v4  ;;  %v417_v21 = vpack.c.bf16 %v40_v20, %v39_v19  ;;  %v32_v22 = vld [vmem:[%s577_s0] sm:$0x3]  ;;  %v206_v26 = vld [vmem:[%s576_s5 + $0x30] sm:$0xff]  ;;  %v207_v27 = vld [vmem:[%s576_s5 + $0x38] sm:$0xff] }
   0x7   :  { %v204_v23 = vld [vmem:[%s576_s5 + $0x20] sm:$0xff]  ;;  %v429_v28 = vpack.c.bf16 %v207_v27, %v206_v26  ;;  %vm301_vm3 = vcmp.ge.f32.partialorder %v32_v22, -3.0  ;;  %vm302_vm4 = vcmp.le.f32.partialorder %v32_v22, 3.0 }
   0x8   :  { %412 = vmatpush3.bf16.msra.mxu1 %v411_v9  ;;  %421 = vmatpush3.bf16.msra.mxu0 %v420_v16  ;;  %v426_v25 = vpack.c.bf16 %v205_v24, %v204_v23  ;;  %vm303_vm5 = vmand %vm301_vm3, %vm302_vm4  ;;  %v339_v44 = vld [vmem:[%s578_s4] ss:$0 sm:$0xff] }
   0x9   :  { %413 = vmatprep.subr.bf16.mxu1 %v440_v0  ;;  %422 = vmatprep.subr.bf16.mxu0 %v440_v0  ;;  %v304_v31 = vsel %vm303_vm5, 0.5, %v444_v30  ;;  %v305_v33 = vsel %vm303_vm5, 0.5, %v445_v32  ;;  %v343_v52 = vld [vmem:[%s579_s8] ss:$0 sm:$0xff] }
   0xa   :  { %v306_v34 = vmul.f32 %v304_v31, %v32_v22  ;;  %v340_v55 = vld [vmem:[%s580_s6] ss:$0 sm:$0xff] }
   0xb   :  { %v342_v59 = vld [vmem:[%s581_s7] ss:$0 sm:$0xff] }
   0xc   :  { %415 = vmatpush3.bf16.msra.mxu1 %v414_v17  ;;  %424 = vmatpush3.bf16.msra.mxu0 %v423_v18  ;;  %v307_v35 = vadd.f32 %v306_v34, %v305_v33 }
   0xd   :  { %416 = vmatprep.subr.bf16.mxu1 %v440_v0  ;;  %425 = vmatprep.subr.bf16.mxu0 %v440_v0 }
   0xe   :  { %v308_v36 = vmax.f32 %v307_v35, 0.0 }
  0x10   :  { %418 = vmatpush3.bf16.msra.mxu1 %v417_v21  ;;  %427 = vmatpush3.bf16.msra.mxu0 %v426_v25  ;;  %v309_v37 = vmin.f32 %v308_v36, 1.0 }
  0x11   :  { %428 = vmatprep.subr.bf16.mxu0 %v440_v0 }
  0x12   :  { %v310_v38 = vmul.f32 9.0, %v309_v37 }
  0x13   :  { %386 = vmatmul.mubr.msk.f32.vlgmr.msra.gmra.mrb[0].mxu1 %vm117_vm2, %v32_v22 }
  0x14   :  { %430 = vmatpush3.bf16.msra.mxu0 %v429_v28  ;;  %v431_v39 = vtrunc.f32 %v310_v38 }
  0x16   :  { %v432_v40 = vcvt.f32.s32 %v431_v39 }
  0x18   :  { %315 = vperm.xlu0 %439, %v432_v40  }
  0x97   :  { %v316_v51 = vpop.permute.xlu0 %315 }
  0x98   :  { %vm317_vm7 = vcmp.eq.s32.totalorder %v313_v50, %v316_v51 }
  0x99   :  { %v325_v53 = vsel %vm317_vm7, %v343_v52, 0.0 }
  0x9a   :  { %v327_v54 = vsel %vm326_vm6, %v325_v53, 0.0 }
  0x9b   :  { %328 = vadd.xlane.f32.xlu1 %v327_v54 }
  0xd8   :  { %v113_v41 = vpop.f32.mrb[0].mxu0 }
  0xd9   :  { %v368_v42 = vpop.f32.mrb[1].mxu0 }
  0xe6   :  { %v187_v43 = vpop.f32.mrb[0].mxu1 }
  0xe7   :  { %v188_v45 = vadd.f32 %v187_v43, %v113_v41  ;;  %v387_v46 = vpop.f32.mrb[1].mxu1 }
  0xe9   :  { %v198_v47 = vadd.f32 %v339_v44, %v188_v45 }
  0xeb   :  { %v199_v48 = vmax.f32 %v198_v47, 0.0 }
  0xed   :  { %405 = vmatmul.mubr.msk.f32.vlgmr.msra.gmra.mrb[2].mxu0 %vm117_vm2, %v199_v48 }
 0x128   :  { %v329_v63 = vpop.xlane.xlu1 %328 }
 0x1c0   :  { %v284_v56 = vpop.f32.mrb[2].mxu0 }
 0x1c1   :  { %v285_v57 = vadd.f32 %v340_v55, %v284_v56  ;;  %v406_v58 = vpop.f32.mrb[3].mxu0 }
 0x1c3   :  { %v288_v60 = vmax.f32 %v285_v57, 0.0 }
 0x1c5   :  { %v296_v61 = vmul.f32 %v342_v59, %v288_v60 }
 0x1c7   :  { %v298_v62 = vsel %vm297_vm8, %v296_v61, 0.0 }
 0x1c8   :  { %299 = vadd.xlane.f32.xlu0 %v298_v62 }
 0x255   :  { %v300_v0 = vpop.xlane.xlu0 %299 }
 0x256   :  { %v330_v1 = vadd.f32 %v329_v63, %v300_v0 }
 0x258   :  { %332 = vst.msk [vmem:[%s582_s9] sm:$0x3] %vm331_vm9, %v330_v1 }

</bundles_post_ra>
